<compile_context>
chip_gen: v6e
topology: v6e:2x2x1
jax: 0.10.0
libtpu: 0.0.40
codegen_flags: <defaults>
</compile_context>

<pallas_src>
import jax
import jax.numpy as jnp
from jax.experimental import pallas as pl
from jax.experimental.pallas import tpu as pltpu


def _round_up(x: int, m: int) -> int:
    return (x + m - 1) // m * m


_VMEM_BUDGET = 24 * 1024 * 1024   # keep tiles under this (v7x: 64 MiB physical VMEM)
_VMEM_LIMIT = 40 * 1024 * 1024    # explicit scoped limit (> v5e/v6e defaults, < v7x physical)


def _vmem_bytes(tm: int, tk: int, Hp: int, Cp: int) -> int:
    x_buf = 2 * tm * tk * 2       # bf16 x tile, double-buffered
    w1_buf = 2 * tk * Hp * 2      # bf16 W1 tile, double-buffered
    w2_buf = Hp * Cp * 2          # bf16 W2, single buffer (Buffered(1))
    bias = Hp * 4 + Cp * 4        # f32 biases, single buffer
    out_buf = 2 * tm * Cp * 4     # f32 logits tile, double-buffered
    acc = tm * Hp * 4             # f32 accumulator scratch
    return x_buf + w1_buf + w2_buf + bias + out_buf + acc


def mlp_kernel(x_ref, w1_ref, b1_ref, w2_ref, b2_ref, o_ref, acc_ref):
    # x_ref:  (tm, tk)  bf16   batch tile x K tile of the flattened image
    # w1_ref: (tk, Hp)  bf16   K tile of first linear weight
    # b1_ref: (1, Hp)   f32    first bias (padded)
    # w2_ref: (Hp, Cp)  bf16   second linear weight (padded)
    # b2_ref: (1, Cp)   f32    second bias (padded)
    # o_ref:  (tm, Cp)  f32    logits tile (padded classes)
    # acc_ref:(tm, Hp)  f32    VMEM accumulator for the first matmul
    k = pl.program_id(1)

    @pl.when(k == 0)
    def _():
        # Seed the accumulator with the bias: drops the epilogue (tm, Hp) add.
        acc_ref[...] = jnp.broadcast_to(b1_ref[...], acc_ref.shape)

    acc_ref[...] += jnp.dot(
        x_ref[...], w1_ref[...], preferred_element_type=jnp.float32
    )

    @pl.when(k == pl.num_programs(1) - 1)
    def _():
        h = jnp.maximum(acc_ref[...], 0.0)  # bias already folded in -> just ReLU
        logits = (
            jnp.dot(
                h.astype(w2_ref.dtype), w2_ref[...],
                preferred_element_type=jnp.float32,
            )
            + b2_ref[...]
        )
        o_ref[...] = logits.astype(o_ref.dtype)


def prepare_params(w1, b1, w2, b2):
    """One-time cast/pad of the weights (hoisted out of the forward path).

    w1: (D, hidden), b1: (hidden,), w2: (hidden, C), b2: (C,)  (all f32).
    Returns a dict of padded bf16 weights / f32 biases plus shape metadata.
    """
    D, H = w1.shape
    C = w2.shape[1]
    Dp = _round_up(D, 128)
    Hp = _round_up(H, 128)
    Cp = _round_up(C, 128)
    w1p = jnp.pad(w1.astype(jnp.bfloat16), ((0, Dp - D), (0, Hp - H)))
    b1p = jnp.pad(b1.astype(jnp.float32).reshape(1, H), ((0, 0), (0, Hp - H)))
    w2p = jnp.pad(w2.astype(jnp.bfloat16), ((0, Hp - H), (0, Cp - C)))
    b2p = jnp.pad(b2.astype(jnp.float32).reshape(1, C), ((0, 0), (0, Cp - C)))
    return dict(w1p=w1p, b1p=b1p, w2p=w2p, b2p=b2p,
                D=D, H=H, C=C, Dp=Dp, Hp=Hp, Cp=Cp)


def _pick_tm(B: int, Hp: int, Cp: int, tm) -> int:
    if tm is None:
        if B <= 256:
            tm = _round_up(max(B, 16), 16)   # single batch tile, never below 16
        elif B <= 1024:
            tm = 256
        else:
            tm = 512
    else:
        tm = _round_up(max(tm, 16), 16)      # bf16 packs 16 rows per packed vreg
    # Keep the accumulator / output buffers inside the VMEM budget for huge Hp.
    while tm > 16 and _vmem_bytes(tm, 128, Hp, Cp) > _VMEM_BUDGET:
        tm = _round_up(tm // 2, 16)
    return tm


def _pick_tk(Dp: int, tm: int, Hp: int, Cp: int) -> int:
    target = min(2048, Dp)
    best = 128
    cand = 128
    while cand <= target:
        if Dp % cand == 0 and _vmem_bytes(tm, cand, Hp, Cp) <= _VMEM_BUDGET:
            best = cand
        cand += 128
    return best


def mlp_forward_prepared(x_nchw, prepared, *, tm=None, tk=None):
    """x_nchw: (b, 3, H, W) float32; prepared = prepare_params(...).
    Returns (b, num_classes) float32 logits."""
    B = x_nchw.shape[0]
    x_flat = x_nchw.reshape(B, -1).astype(jnp.float32)  # torch .view(b, -1) order
    D, C = prepared["D"], prepared["C"]
    Dp, Hp, Cp = prepared["Dp"], prepared["Hp"], prepared["Cp"]
    assert x_flat.shape[1] == D, (x_flat.shape, D)

    tm = _pick_tm(B, Hp, Cp, tm)
    Bp = _round_up(B, tm)

    w1p = prepared["w1p"]
    if tk is None:
        tk = _pick_tk(Dp, tm, Hp, Cp)
        Dp_run = Dp
    else:
        tk = _round_up(tk, 128)
        Dp_run = _round_up(Dp, tk)
        if Dp_run > Dp:   # user-chosen tk that doesn't divide padded D
            w1p = jnp.pad(w1p, ((0, Dp_run - Dp), (0, 0)))

    xp = jnp.pad(x_flat.astype(jnp.bfloat16), ((0, Bp - B), (0, Dp_run - D)))

    grid = (Bp // tm, Dp_run // tk)  # (batch tiles, K tiles) -- reduction last

    flops = 2 * Bp * Dp_run * Hp + 2 * Bp * Hp * Cp
    bytes_accessed = (
        (Bp // tm) * Dp_run * Hp * 2   # W1 re-streamed once per batch tile
        + Bp * Dp_run * 2              # x (bf16)
        + Hp * Cp * 2 + Hp * 4 + Cp * 4
        + Bp * Cp * 4                  # logits out
    )

    out_padded = pl.pallas_call(
        mlp_kernel,
        out_shape=jax.ShapeDtypeStruct((Bp, Cp), jnp.float32),
        grid_spec=pltpu.PrefetchScalarGridSpec(
            num_scalar_prefetch=0,
            grid=grid,
            in_specs=[
                pl.BlockSpec((tm, tk), lambda i, k: (i, k)),   # x
                pl.BlockSpec((tk, Hp), lambda i, k: (k, 0)),   # w1 (streamed over K)
                pl.BlockSpec((1, Hp), lambda i, k: (0, 0),     # b1 (resident, 1 buffer)
                             pipeline_mode=pl.Buffered(1)),
                pl.BlockSpec((Hp, Cp), lambda i, k: (0, 0),    # w2 (resident, 1 buffer)
                             pipeline_mode=pl.Buffered(1)),
                pl.BlockSpec((1, Cp), lambda i, k: (0, 0),     # b2 (resident, 1 buffer)
                             pipeline_mode=pl.Buffered(1)),
            ],
            out_specs=pl.BlockSpec((tm, Cp), lambda i, k: (i, 0)),
            scratch_shapes=[pltpu.VMEM((tm, Hp), jnp.float32)],
        ),
        compiler_params=pltpu.CompilerParams(
            dimension_semantics=("parallel", "arbitrary"),
            vmem_limit_bytes=_VMEM_LIMIT,
        ),
        cost_estimate=pl.CostEstimate(
            flops=int(flops), transcendentals=0, bytes_accessed=int(bytes_accessed)
        ),
    )(xp, w1p, prepared["b1p"], prepared["w2p"], prepared["b2p"])

    return out_padded[:B, :C]


def mlp_classifier_forward(x_nchw, w1, b1, w2, b2, *, tm=None, tk=None):
    """Convenience wrapper (prepares weights per call). For repeated inference,
    call prepare_params() once and reuse with mlp_forward_prepared()."""
    return mlp_forward_prepared(x_nchw, prepare_params(w1, b1, w2, b2), tm=tm, tk=tk)


def init_params(key, input_dim, hidden_dim, num_classes):
    """Deterministic init mirroring nn.Linear's default U(-1/sqrt(fan_in), +1/sqrt(fan_in))."""
    k1, k2, k3, k4 = jax.random.split(key, 4)
    lim1 = 1.0 / jnp.sqrt(jnp.float32(input_dim))
    lim2 = 1.0 / jnp.sqrt(jnp.float32(hidden_dim))
    # stored as (in, out) so the kernel computes x @ W
    w1 = jax.random.uniform(k1, (input_dim, hidden_dim), jnp.float32, -lim1, lim1)
    b1 = jax.random.uniform(k2, (hidden_dim,), jnp.float32, -lim1, lim1)
    w2 = jax.random.uniform(k3, (hidden_dim, num_classes), jnp.float32, -lim2, lim2)
    b2 = jax.random.uniform(k4, (num_classes,), jnp.float32, -lim2, lim2)
    return w1, b1, w2, b2


def _reference(x_nchw, w1, b1, w2, b2):
    # Reference mimicking the kernel's bf16-input / f32-accumulate numerics.
    xb = x_nchw.reshape(x_nchw.shape[0], -1).astype(jnp.bfloat16).astype(jnp.float32)
    w1b = w1.astype(jnp.bfloat16).astype(jnp.float32)
    w2b = w2.astype(jnp.bfloat16).astype(jnp.float32)
    h = jnp.maximum(xb @ w1b + b1, 0.0)
    hb = h.astype(jnp.bfloat16).astype(jnp.float32)
    return hb @ w2b + b2


if __name__ == "__main__":
    key = jax.random.PRNGKey(0)

    # Test 1: D = 3*32*32 = 3072 -> auto tk = 1536 (2 reduction steps), tm = 16.
    # Weights prepared once and reused across two forwards (hoisted cast/pad).
    batch, h, w = 4, 32, 32
    hidden_dim, num_classes = 192, 6
    input_dim = 3 * h * w
    kx, kp, key = jax.random.split(key, 3)
    x = jax.random.normal(kx, (batch, 3, h, w), jnp.float32)
    params = init_params(kp, input_dim, hidden_dim, num_classes)
    prepared = prepare_params(*params)

    logits = mlp_forward_prepared(x, prepared)
    logits = jax.block_until_ready(logits)
    ref = _reference(x, *params)
    assert logits.shape == (batch, num_classes)
    assert jnp.allclose(logits, ref, atol=1e-2, rtol=1e-2), float(
        jnp.max(jnp.abs(logits - ref))
    )
    logits_again = jax.block_until_ready(mlp_forward_prepared(x, prepared))
    assert jnp.allclose(logits_again, logits)

    # Test 2: multiple batch tiles and multiple K tiles (tm=16, tk=256).
    batch2, h2, w2_ = 20, 16, 16
    hidden2, classes2 = 32, 6
    input_dim2 = 3 * h2 * w2_
    kx2, kp2, key = jax.random.split(key, 3)
    x2 = jax.random.normal(kx2, (batch2, 3, h2, w2_), jnp.float32)
    params2 = init_params(kp2, input_dim2, hidden2, classes2)

    logits2 = mlp_classifier_forward(x2, *params2, tm=16, tk=256)
    logits2 = jax.block_until_ready(logits2)
    ref2 = _reference(x2, *params2)
    assert logits2.shape == (batch2, classes2)
    assert jnp.allclose(logits2, ref2, atol=1e-2, rtol=1e-2), float(
        jnp.max(jnp.abs(logits2 - ref2))
    )

    # Test 3: the module's default spec (h=w=64 -> D=12288, hidden=192, C=6).
    batch3 = 8
    input_dim3 = 3 * 64 * 64
    kx3, kp3 = jax.random.split(key)
    x3 = jax.random.normal(kx3, (batch3, 3, 64, 64), jnp.float32)
    params3 = init_params(kp3, input_dim3, 192, 6)
    logits3 = jax.block_until_ready(mlp_classifier_forward(x3, *params3))
    ref3 = _reference(x3, *params3)
    assert logits3.shape == (batch3, 6)
    assert jnp.allclose(logits3, ref3, atol=1e-2, rtol=1e-2), float(
        jnp.max(jnp.abs(logits3 - ref3))
    )

    print("KERNEL_OK")
</pallas_src>

<mosaic_0001>
module attributes {stable_mosaic.version = 11 : i64} {
  func.func @mlp_kernel(%arg0: i32, %arg1: i32, %arg2: memref<16x1536xbf16, #tpu.memory_space<vmem>>, %arg3: memref<1536x256xbf16, #tpu.memory_space<vmem>>, %arg4: memref<1x256xf32, #tpu.memory_space<vmem>>, %arg5: memref<256x128xbf16, #tpu.memory_space<vmem>>, %arg6: memref<1x128xf32, #tpu.memory_space<vmem>>, %arg7: memref<16x128xf32, #tpu.memory_space<vmem>>, %arg8: memref<16x256xf32, #tpu.memory_space<vmem>>) attributes {dimension_semantics = [#tpu.dimension_semantics<parallel>, #tpu.dimension_semantics<arbitrary>], iteration_bounds = array<i64: 1, 2>, scalar_prefetch = 0 : i64, scratch_operands = 1 : i64, tpu.core_type = #tpu.core_type<tc>, window_params = [{transform_indices = @transform_0, window_bounds = array<i64: 16, 1536>}, {transform_indices = @transform_1, window_bounds = array<i64: 1536, 256>}, {pipeline_mode = #tpu.pipeline_mode<synchronous>, transform_indices = @transform_2, window_bounds = array<i64: 1, 256>}, {pipeline_mode = #tpu.pipeline_mode<synchronous>, transform_indices = @transform_3, window_bounds = array<i64: 256, 128>}, {pipeline_mode = #tpu.pipeline_mode<synchronous>, transform_indices = @transform_4, window_bounds = array<i64: 1, 128>}, {transform_indices = @transform_5, window_bounds = array<i64: 16, 128>}]} {
    %c0_i32 = arith.constant 0 : i32
    %0 = arith.cmpi eq, %arg1, %c0_i32 : i32
    %1 = arith.extui %0 : i1 to i32
    %c0_i32_0 = arith.constant 0 : i32
    %2 = arith.cmpi ne, %1, %c0_i32_0 : i32
    scf.if %2 {
      %c0_9 = arith.constant 0 : index
      %c0_10 = arith.constant 0 : index
      %12 = vector.load %arg4[%c0_9, %c0_10] : memref<1x256xf32, #tpu.memory_space<vmem>>, vector<1x256xf32>
      %13 = vector.shape_cast %12 : vector<1x256xf32> to vector<1x256xf32>
      %14 = vector.broadcast %13 : vector<1x256xf32> to vector<16x256xf32>
      %c0_11 = arith.constant 0 : index
      %c0_12 = arith.constant 0 : index
      %15 = vector.load %arg8[%c0_11, %c0_12] : memref<16x256xf32, #tpu.memory_space<vmem>>, vector<16x256xf32>
      tpu.vector_store %arg8[%c0_11, %c0_12], %14 {strides = array<i32>} : memref<16x256xf32, #tpu.memory_space<vmem>>, vector<16x256xf32>,
    } else {
    }
    %c0 = arith.constant 0 : index
    %c0_1 = arith.constant 0 : index
    %3 = vector.load %arg8[%c0, %c0_1] : memref<16x256xf32, #tpu.memory_space<vmem>>, vector<16x256xf32>
    %c0_2 = arith.constant 0 : index
    %c0_3 = arith.constant 0 : index
    %4 = vector.load %arg2[%c0_2, %c0_3] : memref<16x1536xbf16, #tpu.memory_space<vmem>>, vector<16x1536xbf16>
    %c0_4 = arith.constant 0 : index
    %c0_5 = arith.constant 0 : index
    %5 = vector.load %arg3[%c0_4, %c0_5] : memref<1536x256xbf16, #tpu.memory_space<vmem>>, vector<1536x256xbf16>
    %cst = arith.constant dense<0.000000e+00> : vector<16x256xf32>
    %6 = tpu.matmul %4, %5, %cst {dimension_numbers = #tpu.dot_dimension_numbers<[1], [0], [0], [1], [0, 0, 1, 1], [], []>} : vector<16x1536xbf16>, vector<1536x256xbf16>, vector<16x256xf32> -> vector<16x256xf32>
    %7 = arith.addf %3, %6 : vector<16x256xf32>
    %c0_6 = arith.constant 0 : index
    %c0_7 = arith.constant 0 : index
    %8 = vector.load %arg8[%c0_6, %c0_7] : memref<16x256xf32, #tpu.memory_space<vmem>>, vector<16x256xf32>
    tpu.vector_store %arg8[%c0_6, %c0_7], %7 {strides = array<i32>} : memref<16x256xf32, #tpu.memory_space<vmem>>, vector<16x256xf32>,
    %c1_i32 = arith.constant 1 : i32
    %9 = arith.cmpi eq, %arg1, %c1_i32 : i32
    %10 = arith.extui %9 : i1 to i32
    %c0_i32_8 = arith.constant 0 : i32
    %11 = arith.cmpi ne, %10, %c0_i32_8 : i32
    scf.if %11 {
      %c0_9 = arith.constant 0 : index
      %c0_10 = arith.constant 0 : index
      %12 = vector.load %arg8[%c0_9, %c0_10] : memref<16x256xf32, #tpu.memory_space<vmem>>, vector<16x256xf32>
      %cst_11 = arith.constant 0.000000e+00 : f32
      %13 = vector.broadcast %cst_11 : f32 to vector<16x256xf32>
      %14 = arith.maximumf %12, %13 : vector<16x256xf32>
      %15 = arith.truncf %14 : vector<16x256xf32> to vector<16x256xbf16>
      %c0_12 = arith.constant 0 : index
      %c0_13 = arith.constant 0 : index
      %16 = vector.load %arg5[%c0_12, %c0_13] : memref<256x128xbf16, #tpu.memory_space<vmem>>, vector<256x128xbf16>
      %cst_14 = arith.constant dense<0.000000e+00> : vector<16x128xf32>
      %17 = tpu.matmul %15, %16, %cst_14 {dimension_numbers = #tpu.dot_dimension_numbers<[1], [0], [0], [1], [0, 0, 1, 1], [], []>} : vector<16x256xbf16>, vector<256x128xbf16>, vector<16x128xf32> -> vector<16x128xf32>
      %c0_15 = arith.constant 0 : index
      %c0_16 = arith.constant 0 : index
      %18 = vector.load %arg6[%c0_15, %c0_16] : memref<1x128xf32, #tpu.memory_space<vmem>>, vector<1x128xf32>
      %19 = vector.broadcast %18 : vector<1x128xf32> to vector<16x128xf32>
      %20 = arith.addf %17, %19 : vector<16x128xf32>
      %c0_17 = arith.constant 0 : index
      %c0_18 = arith.constant 0 : index
      %21 = vector.load %arg7[%c0_17, %c0_18] : memref<16x128xf32, #tpu.memory_space<vmem>>, vector<16x128xf32>
      tpu.vector_store %arg7[%c0_17, %c0_18], %20 {strides = array<i32>} : memref<16x128xf32, #tpu.memory_space<vmem>>, vector<16x128xf32>,
    } else {
    }
    return
  }
  func.func @transform_0(%arg0: i32, %arg1: i32) -> (i32, i32) {
    %c0_i32 = arith.constant 0 : i32
    return %arg0, %arg1 : i32, i32
  }
  func.func @transform_1(%arg0: i32, %arg1: i32) -> (i32, i32) {
    %c0_i32 = arith.constant 0 : i32
    %c0_i32_0 = arith.constant 0 : i32
    return %arg1, %c0_i32 : i32, i32
  }
  func.func @transform_2(%arg0: i32, %arg1: i32) -> (i32, i32) {
    %c0_i32 = arith.constant 0 : i32
    %c0_i32_0 = arith.constant 0 : i32
    %c0_i32_1 = arith.constant 0 : i32
    return %c0_i32, %c0_i32_0 : i32, i32
  }
  func.func @transform_3(%arg0: i32, %arg1: i32) -> (i32, i32) {
    %c0_i32 = arith.constant 0 : i32
    %c0_i32_0 = arith.constant 0 : i32
    %c0_i32_1 = arith.constant 0 : i32
    return %c0_i32, %c0_i32_0 : i32, i32
  }
  func.func @transform_4(%arg0: i32, %arg1: i32) -> (i32, i32) {
    %c0_i32 = arith.constant 0 : i32
    %c0_i32_0 = arith.constant 0 : i32
    %c0_i32_1 = arith.constant 0 : i32
    return %c0_i32, %c0_i32_0 : i32, i32
  }
  func.func @transform_5(%arg0: i32, %arg1: i32) -> (i32, i32) {
    %c0_i32 = arith.constant 0 : i32
    %c0_i32_0 = arith.constant 0 : i32
    return %arg0, %c0_i32 : i32, i32
  }
}

</mosaic_0001>

<bundles_post_ra>
// kernel: tpu_custom_call.1
= control target key start
LH: loop header
LB: loop body
LE: loop exit
PB: predicated region body
PF: predicated region fallthrough
CT: control target
= control target key end

     0   :  { %s3526_s0 = inlined_call_operand.hbm [shape: bf16[16,3072], index: 0, kind: input, shape index: {}]   ;;  %s3527_s1 = inlined_call_operand.hbm [shape: bf16[3072,256], index: 1, kind: input, shape index: {}]   ;;  %s3528_s2 = inlined_call_operand.hbm [shape: f32[1,256], index: 2, kind: input, shape index: {}]   ;;  %s3529_s3 = inlined_call_operand.hbm [shape: bf16[256,128], index: 3, kind: input, shape index: {}]   ;;  %s3530_s4 = inlined_call_operand.hbm [shape: f32[1,128], index: 4, kind: input, shape index: {}]   ;;  %s3531_s5 = inlined_call_operand.hbm [shape: f32[16,128], index: 5, kind: output, shape index: {}]  }
   0x1   :  { %3536 = sst [smem:[#allocation19_spill]] %s3526_s0 }
   0x2   :  { %3537 = sst [smem:[#allocation20_spill]] %s3528_s2 }
   0x3   :  { %3538 = sst [smem:[#allocation21_spill]] %s3529_s3 }
   0x4   :  { %3539 = sst [smem:[#allocation22_spill]] %s3530_s4 }
   0x5   :  { %10 = vsyncpa [#allocation4], 0 }
   0x6   :  { %12 = vsyncpa [#allocation4 + $0x1], 0 }
   0x7   :  { %13 = vsyncpa [#allocation7], 0 }
   0x8   :  { %15 = vsyncpa [#allocation7 + $0x1], 0 }
   0x9   :  { %16 = vsyncpa [#allocation10], 0 }
   0xa   :  { %17 = vsyncpa [#allocation5], 0  ;;  %s3141_s18 = smov 0   ;;  %s3143_s19 = smov 0  }
   0xb   :  { %s3145_s20 = smov 0   ;;  %s3147_s21 = smov 0  }
   0xc   :  { %s3149_s22 = smov 0   ;;  %s3151_s23 = smov 0  }
   0xd LB: > { %s3170_s24 = sadd.s32 4294967295, %s3094_s23   ;;  %s44_s25 = sadd.s32 1, %s3082_s20  ;;  %s3094_s23 = sphi %s3151_s23, %s23_s23   ;;  %s3090_s22 = sphi %s3149_s22, %s3561_s22   ;;  %s3086_s21 = sphi %s3147_s21, %s3560_s21   ;;  %s3082_s20 = sphi %s3145_s20, %s3559_s20   ;;  %s3078_s19 = sphi %s3143_s19, %s3558_s19   ;;  %s3074_s18 = sphi %s3141_s18, %s3557_s18  }
   0xe   : > { %p51_p0 = scmp.ne.s32.totalorder %s3082_s20, %s3078_s19  ;;  %p52_p1 = scmp.eq.s32.totalorder %s3094_s23, 0 }
   0xf   : > { %p57_p2 = scmp.ne.s32.totalorder %s3078_s19, %s3074_s18  ;;  %p3532_p3 = scmp.eq.s32.totalorder %s3170_s24, 0 }
  0x10   : > { %p53_p4 = por %p52_p1, %p51_p0  ;;  %p2172_p5 = scmp.ge.s32.totalorder %s3094_s23, 1 }
  0x11   : > { %p3181_p6 = por %p3532_p3, %p57_p2  ;;  %p183_p7 = scmp.lt.s32.totalorder %s3094_s23, 3 }
  0x12   : > { %s3096_s28 = smov [#allocation8]   ;;  %p2481_p10 = scmp.lt.s32.totalorder %s3094_s23, 2 }
  0x13   : > { %s3540_s26 = scalar_select %p3181_p6, 1, 0 }
  0x14   : > { %p3186_p8 = pnand %p2172_p5, %p183_p7  ;;  %s196_s29 = sshll.u32 %s3096_s28, 4  ;;  %s197_s29 = int_to_ptr.vmem [resolvable:$true] %s196_s29 }
  0x15   : > { %p3199_p12 = pnand %p2481_p10, %p53_p4  ;;  %s3097_s7 = smov [#allocation9]  }
  0x16   : > { %s3541_s27 = scalar_select %p3186_p8, 1, 0 }
  0x17   : > { %p2461_p9 = pneg %p3186_p8  ;;  %s206_s8 = sshll.u32 %s3097_s7, 4  ;;  %s207_s8 = int_to_ptr.vmem [resolvable:$true] %s206_s8 }
  0x18   : > { %s2881_s9 = scalar_lea.vmem %s197_s29, 32  ;;  %p2889_p5 = scmp.lt.s32.totalorder %s197_s29, %s197_s29 }
  0x19   : > { %p3195_p11 = pnand %p2461_p9, %p3532_p3  ;;  %p2882_p0 = scmp.ne.s32.totalorder %s197_s29, %s2881_s9 }
  0x1a   : > { %p2890_p7 = scmp.lt.s32.totalorder %s2881_s9, %s2881_s9 }
  0x1b   : > { %p2872_p13 = pneg %p3195_p11 }
  0x1c   : > { %p2891_p9 = por %p2890_p7, %p2889_p5 }
  0x1d   : > { %p2884_p1 = pnand %p2882_p0, %p2872_p13 }
  0x1f   : > { %p2885_p2 = pneg %p2884_p1 }
  0x21   : > { %p2892_p3 = pnand %p2891_p9, %p2885_p2 }
  0x23   : > { %2895 = shalt.err (!%p2892_p3)
}
  0x24   : > { %s3544_s2 = sld [smem:[#allocation20_spill]]  ;;  %s2907_s12 = scalar_lea.vmem %s207_s8, 2048 }
  0x25   : > { %p2908_p4 = scmp.ne.s32.totalorder %s207_s8, %s2907_s12  ;;  %p2915_p1 = scmp.lt.s32.totalorder %s207_s8, %s207_s8 }
  0x26   : > { %p2916_p6 = scmp.lt.s32.totalorder %s2907_s12, %s2907_s12 }
  0x27   : > { %p2910_p10 = pnand %p2908_p4, %p2872_p13 }
  0x28   : > { %p2917_p8 = por %p2916_p6, %p2915_p1 }
  0x29   : > { %p2911_p0 = pneg %p2910_p10 }
  0x2a   : > { %2464 = dma.hbm_to_vmem [thread:$0]  (!%p3195_p11), %s3544_s2, 32, %s197_s29, [#allocation7]  }
  0x2b   : > { %p2918_p5 = pnand %p2917_p8, %p2911_p0 }
  0x2d   : > { %2921 = shalt.err (!%p2918_p5)
}
  0x2e   : > { %s3098_s13 = smov 64   ;;  %s3099_s14 = smov 4  }
  0x2f   : > { %s3545_s3 = sld [smem:[#allocation21_spill]]  ;;  %s3100_s17 = smov [#allocation11]  }
  0x30   : > { %s220_s18 = sshll.u32 %s3100_s17, 4  ;;  %s221_s18 = int_to_ptr.vmem [resolvable:$true] %s220_s18 }
  0x31   : > { %s2933_s28 = scalar_lea.vmem %s221_s18, 16  ;;  %s2940_s29 = scalar_lea.vmem %s221_s18, 32 }
  0x32   : > { %p2934_p3 = scmp.ne.s32.totalorder %s221_s18, %s2933_s28  ;;  %p2941_p8 = scmp.lt.s32.totalorder %s221_s18, %s221_s18 }
  0x33   : > { %p2942_p7 = scmp.lt.s32.totalorder %s2940_s29, %s2933_s28 }
  0x34   : > { %p2936_p2 = pnand %p2934_p3, %p2872_p13 }
  0x35   : > { %2467 = dma.hbm_to_vmem [thread:$0]  (!%p3195_p11), %s3545_s3, 2048, %s207_s8, [#allocation10], %s3098_s13, %s3098_s13, %s3099_s14  }
  0x36   : > { %p2937_p6 = pneg %p2936_p2  ;;  %p2943_p9 = por %p2942_p7, %p2941_p8 }
  0x38   : > { %p2944_p4 = pnand %p2943_p9, %p2937_p6 }
  0x3a   : > { %2947 = shalt.err (!%p2944_p4)
}
  0x3b   : > { %s3546_s4 = sld [smem:[#allocation22_spill]]  ;;  %s32_s8 = sadd.s32 1, %s3090_s22 }
  0x3c   : > { %s3231_s10 = sand.u32 1, %s3082_s20   ;;  %p33_p13 = scmp.ge.s32.totalorder %s32_s8, 2 }
  0x3d   : > { %s2437_s30 = smul.u32 96, %s3231_s10  ;;  %s3548_s0 = sld [smem:[#allocation19_spill]] }
  0x3e   : > { %s3563_s8 = smov (%p33_p13, %s32_s8), 0  ;;  %s2411_s11 = smul.u32 768, %s3090_s22 }
  0x3f   : > { %3547 = sst [smem:[#allocation18_spill]] %s3563_s8  ;;  %s40_s12 = ssub.s32 %s3090_s22, %s3563_s8 }
  0x40   : > { %s235_s13 = scalar_lea.vmem [#allocation3], %s2437_s30  ;;  %p42_p10 = scmp.eq.s32.totalorder %s40_s12, 0 }
  0x41   : > { %2470 = dma.hbm_to_vmem [thread:$0]  (!%p3195_p11), %s3546_s4, 16, %s221_s18, [#allocation10]  }
  0x42   : > { %s245_s14 = sshll.u32 %s235_s13, 4  ;;  %s255_s28 = sand.u32 1, %s3094_s23   ;;  %s246_s14 = int_to_ptr.vmem [resolvable:$true] %s245_s14 }
  0x43   : > { %s244_s17 = scalar_lea.hbm %s3548_s0, %s2411_s11  ;;  %s232_s29 = scalar_lea.sflag [#allocation4], %s3231_s10 }
  0x44   : > { %s3245_s18 = scalar_select %p42_p10, %s3082_s20, %s44_s25  }
  0x45   : > { %p2950_p11 = pneg %p3199_p12  ;;  %s2961_s7 = scalar_lea.vmem %s246_s14, 1536 }
  0x46   : > { %p2962_p0 = scmp.ne.s32.totalorder %s246_s14, %s2961_s7  ;;  %s3101_s9 = smov [#allocation3]  }
  0x47   : > { %s2966_s30 = sshll.u32 %s3101_s9, 4  ;;  %s2967_s30 = int_to_ptr.vmem [resolvable:$false] %s2966_s30 }
  0x48   : > { %p2964_p1 = pnand %p2962_p0, %p2950_p11  ;;  %s2968_s12 = scalar_lea.vmem %s2967_s30, 3072 }
  0x49   : > { %p2969_p3 = scmp.lt.s32.totalorder %s246_s14, %s2967_s30  ;;  %p2970_p2 = scmp.lt.s32.totalorder %s2968_s12, %s2961_s7 }
  0x4a   : > { %p2965_p5 = pneg %p2964_p1 }
  0x4b   : > { %p2971_p6 = por %p2970_p2, %p2969_p3 }
  0x4d   : > { %p2972_p8 = pnand %p2971_p6, %p2965_p5 }
  0x4f   : > { %2975 = shalt.err (!%p2972_p8)
}
  0x50   : > { %s3102_s25 = smov 1536   ;;  %s3103_s11 = smov 768  }
  0x51   : > { %s3104_s13 = smov 48   ;;  %s2438_s15 = smul.u32 1536, %s3231_s10 }
  0x52   : > { %2474 = dma.hbm_to_vmem [thread:$0]  (!%p3199_p12), %s244_s17, 1536, %s246_s14, %s232_s29, %s3102_s25, %s3103_s11, %s3104_s13  }
  0x53   : > { %s2414_s16 = smul.u32 24576, %s3090_s22  ;;  %s259_s30 = scalar_lea.vmem [#allocation6], %s2438_s15 }
  0x54   : > { %s267_s7 = sshll.u32 %s259_s30, 4  ;;  %s256_s12 = scalar_lea.sflag [#allocation7], %s255_s28  ;;  %s268_s7 = int_to_ptr.vmem [resolvable:$true] %s267_s7 }
  0x55   : > { %s266_s2 = scalar_lea.hbm %s3527_s1, %s2414_s16  ;;  %s2989_s3 = scalar_lea.vmem %s268_s7, 24576 }
  0x56   : > { %p2990_p7 = scmp.ne.s32.totalorder %s268_s7, %s2989_s3  ;;  %s3105_s4 = smov [#allocation6]  }
  0x57   : > { %s2994_s8 = sshll.u32 %s3105_s4, 4  ;;  %s2995_s8 = int_to_ptr.vmem [resolvable:$false] %s2994_s8 }
  0x58   : > { %p2992_p9 = pnand %p2990_p7, %p2950_p11  ;;  %s2996_s14 = scalar_lea.vmem %s2995_s8, 49152 }
  0x59   : > { %p2997_p13 = scmp.lt.s32.totalorder %s268_s7, %s2995_s8  ;;  %p2998_p10 = scmp.lt.s32.totalorder %s2996_s14, %s2989_s3 }
  0x5a   : > { %p2993_p4 = pneg %p2992_p9 }
  0x5b   : > { %p2999_p0 = por %p2998_p10, %p2997_p13 }
  0x5d   : > { %p3000_p1 = pnand %p2999_p0, %p2993_p4 }
  0x5f   : > { %3003 = shalt.err (!%p3000_p1)
}
  0x60   : > { %s3106_s0 = smov 128   ;;  %s3107_s10 = smov 8  }
  0x61   : > { %2477 = dma.hbm_to_vmem [thread:$0]  (!%p3199_p12), %s266_s2, 24576, %s268_s7, %s256_s12, %s3106_s0, %s3106_s0, %s3107_s10  }
  0x62   : > { %p3549_p5 = scmp.ne.s32.totalorder %s3541_s27, 0 }
  0x63   : > { %s281_s17 = sand.u32 (!%p3549_p5), 1, %s3078_s19   ;;  %p3550_p11 = scmp.ne.s32.totalorder (!%p3549_p5), %s3540_s26, 0 }
  0x64   : > { %279 = sbr.rel (%p3549_p5) target bundleno = 786 (0x312), region = 40  ;;  %s282_s4 = scalar_lea.sflag (!%p3549_p5), [#allocation4], %s281_s17 }
  0x65   : > { %s2439_s28 = smul.u32 (!%p3549_p5), 96, %s281_s17 }
  0x67   : > { %s3269_s29 = scalar_lea.vmem (!%p3549_p5), [#allocation3], %s2439_s28 }
  0x69   : > { %3053 = dma.done.wait (%p3550_p11), %s282_s4, 1536  }
  0x6a   : > { %3055 = vsyncadd (%p3550_p11), %s282_s4, 4294965760  ;;  %s290_s3 = sand.u32 1, %s3170_s24   ;;  %s2440_s6 = smul.u32 1536, %s281_s17 }
  0x6b   : > { %s291_s2 = scalar_lea.sflag [#allocation7], %s290_s3 }
  0x6c   : > { %s3276_s8 = scalar_lea.vmem [#allocation6], %s2440_s6 }
  0x6d   : > { %3057 = dma.done.wait (%p3550_p11), %s291_s2, 24576  }
  0x6e   : > { %3059 = vsyncadd (%p3550_p11), %s291_s2, 4294942720  ;;  %p3551_p12 = scmp.eq.s32.totalorder %s3170_s24, 0 }
  0x70   : > { %3061 = dma.done.wait (%p3551_p12), [#allocation7], 32   ;;  %p3552_p3 = pmov %p3551_p12 }
  0x72   : > { %3063 = vsyncadd (%p3552_p3), [#allocation7], 4294967264  ;;  %p3553_p2 = pmov %p3552_p3 }
  0x74   : > { %3065 = dma.done.wait (%p3553_p2), [#allocation10], 2064   ;;  %p3554_p6 = pmov %p3553_p2 }
  0x75   : > { %p2184_p8 = scmp.ne.s32.totalorder %s3086_s21, 0 }
  0x76   : > { %3067 = vsyncadd (%p3554_p6), [#allocation10], 4294965232 }
  0x77   : > { %341 = sbr.rel (%p2184_p8) target bundleno = 134 (0x86), region = 64 }
  0x7c   : > { %v344_v0 = vlaneseq  ;;  %v342_v2 = vld [vmem:[#allocation8] sm:$0x3] }
  0x7e   : > { %v345_v1 = vshrl.u32 %v344_v0, 7 }
  0x80   : > { %v346_v3 = vsub.s32 0, %v345_v1  ;;  %v350_v4 = vsub.s32 1, %v345_v1 }
  0x82   : > { %v347_v5 = vrot.slane %v342_v2, %v346_v3  ;;  %v351_v6 = vrot.slane %v342_v2, %v350_v4 }
  0x84   : > { %354 = vst [vmem:[#allocation2 + $0x10] sm:$0xff] %v347_v5  ;;  %356 = vst [vmem:[#allocation2 + $0x18] sm:$0xff] %v347_v5 }
  0x85   : > { %355 = vst [vmem:[#allocation2] sm:$0xff] %v351_v6  ;;  %357 = vst [vmem:[#allocation2 + $0x8] sm:$0xff] %v351_v6 }
  0x86 PF: > { %v2548_v7 = vld [vmem:[%s3276_s8 + $0x74] ss:$8 sps:$4 sm:$0xff]   ;;  %v2552_v9 = vld [vmem:[%s3276_s8 + $0x70] ss:$8 sps:$4 sm:$0xff]   ;;  %v2554_v11 = vld [vmem:[%s3276_s8 + $0x64] ss:$8 sps:$4 sm:$0xff]  }
  0x87   : > { %v2550_v8 = vld [vmem:[%s3276_s8 + $0x174] ss:$8 sps:$4 sm:$0xff]   ;;  %1586 = vmatprep.subr.bf16.mxu0 %v2548_v7  ;;  %v2553_v10 = vld [vmem:[%s3276_s8 + $0x170] ss:$8 sps:$4 sm:$0xff]   ;;  %v2556_v12 = vld [vmem:[%s3276_s8 + $0x164] ss:$8 sps:$4 sm:$0xff]  }
  0x88   : > { %1629 = vmatprep.subr.bf16.mxu1 %v2550_v8  ;;  %1587 = vmatpush1.bf16.msra.mxu0 %v2552_v9  ;;  %v2558_v13 = vld [vmem:[%s3276_s8 + $0x60] ss:$8 sps:$4 sm:$0xff]   ;;  %v2560_v15 = vld [vmem:[%s3276_s8 + $0x54] ss:$8 sps:$4 sm:$0xff]   ;;  %v2564_v17 = vld [vmem:[%s3276_s8 + $0x50] ss:$8 sps:$4 sm:$0xff]  }
  0x89   : > { %1630 = vmatpush1.bf16.msra.mxu1 %v2553_v10  ;;  %1588 = vmatprep.subr.bf16.mxu0 %v2554_v11  ;;  %v2559_v14 = vld [vmem:[%s3276_s8 + $0x160] ss:$8 sps:$4 sm:$0xff]   ;;  %v2562_v16 = vld [vmem:[%s3276_s8 + $0x154] ss:$8 sps:$4 sm:$0xff]   ;;  %v2565_v18 = vld [vmem:[%s3276_s8 + $0x150] ss:$8 sps:$4 sm:$0xff]  }
  0x8a   : > { %1631 = vmatprep.subr.bf16.mxu1 %v2556_v12  ;;  %v2566_v19 = vld [vmem:[%s3276_s8 + $0x44] ss:$8 sps:$4 sm:$0xff]   ;;  %v2570_v21 = vld [vmem:[%s3276_s8 + $0x40] ss:$8 sps:$4 sm:$0xff]   ;;  %v2572_v23 = vld [vmem:[%s3276_s8 + $0x34] ss:$8 sps:$4 sm:$0xff]  }
  0x8b   : > { %v2568_v20 = vld [vmem:[%s3276_s8 + $0x144] ss:$8 sps:$4 sm:$0xff]   ;;  %v2571_v22 = vld [vmem:[%s3276_s8 + $0x140] ss:$8 sps:$4 sm:$0xff]   ;;  %v2574_v24 = vld [vmem:[%s3276_s8 + $0x134] ss:$8 sps:$4 sm:$0xff]  }
  0x8c   : > { %1589 = vmatpush1.bf16.msra.mxu0 %v2558_v13  ;;  %v2576_v25 = vld [vmem:[%s3276_s8 + $0x30] ss:$8 sps:$4 sm:$0xff]   ;;  %v2578_v27 = vld [vmem:[%s3276_s8 + $0x24] ss:$8 sps:$4 sm:$0xff]   ;;  %v2582_v29 = vld [vmem:[%s3276_s8 + $0x20] ss:$8 sps:$4 sm:$0xff]  }
  0x8d   : > { %1632 = vmatpush1.bf16.msra.mxu1 %v2559_v14  ;;  %1590 = vmatprep.subr.bf16.mxu0 %v2560_v15  ;;  %v2577_v26 = vld [vmem:[%s3276_s8 + $0x130] ss:$8 sps:$4 sm:$0xff]   ;;  %v2580_v28 = vld [vmem:[%s3276_s8 + $0x124] ss:$8 sps:$4 sm:$0xff]   ;;  %v2583_v30 = vld [vmem:[%s3276_s8 + $0x120] ss:$8 sps:$4 sm:$0xff]  }
  0x8e   : > { %1633 = vmatprep.subr.bf16.mxu1 %v2562_v16  ;;  %v2584_v31 = vld [vmem:[%s3276_s8 + $0x14] ss:$8 sps:$4 sm:$0xff]   ;;  %v2588_v33 = vld [vmem:[%s3276_s8 + $0x10] ss:$8 sps:$4 sm:$0xff]   ;;  %v2590_v35 = vld [vmem:[%s3276_s8 + $0x4] ss:$8 sps:$4 sm:$0xff]  }
  0x8f   : > { %v2586_v32 = vld [vmem:[%s3276_s8 + $0x114] ss:$8 sps:$4 sm:$0xff]   ;;  %v2589_v34 = vld [vmem:[%s3276_s8 + $0x110] ss:$8 sps:$4 sm:$0xff]   ;;  %v2592_v36 = vld [vmem:[%s3276_s8 + $0x104] ss:$8 sps:$4 sm:$0xff]  }
  0x90   : > { %1591 = vmatpush1.bf16.msra.mxu0 %v2564_v17  ;;  %v2594_v37 = vld [vmem:[%s3276_s8] ss:$8 sps:$4 sm:$0xff]   ;;  %v2596_v39 = vld [vmem:[%s3276_s8 + $0xf4] ss:$8 sps:$4 sm:$0xff]   ;;  %v2600_v41 = vld [vmem:[%s3276_s8 + $0xf0] ss:$8 sps:$4 sm:$0xff]  }
  0x91   : > { %1634 = vmatpush1.bf16.msra.mxu1 %v2565_v18  ;;  %1592 = vmatprep.subr.bf16.mxu0 %v2566_v19  ;;  %v2595_v38 = vld [vmem:[%s3276_s8 + $0x100] ss:$8 sps:$4 sm:$0xff]   ;;  %v2598_v40 = vld [vmem:[%s3276_s8 + $0x1f4] ss:$8 sps:$4 sm:$0xff]   ;;  %v2601_v42 = vld [vmem:[%s3276_s8 + $0x1f0] ss:$8 sps:$4 sm:$0xff]  }
  0x92   : > { %1635 = vmatprep.subr.bf16.mxu1 %v2568_v20  ;;  %v2602_v43 = vld [vmem:[%s3276_s8 + $0xe4] ss:$8 sps:$4 sm:$0xff]   ;;  %v2606_v45 = vld [vmem:[%s3276_s8 + $0xe0] ss:$8 sps:$4 sm:$0xff]   ;;  %v2608_v47 = vld [vmem:[%s3276_s8 + $0xd4] ss:$8 sps:$4 sm:$0xff]  }
  0x93   : > { %v2604_v44 = vld [vmem:[%s3276_s8 + $0x1e4] ss:$8 sps:$4 sm:$0xff]   ;;  %v2607_v46 = vld [vmem:[%s3276_s8 + $0x1e0] ss:$8 sps:$4 sm:$0xff]   ;;  %v2610_v48 = vld [vmem:[%s3276_s8 + $0x1d4] ss:$8 sps:$4 sm:$0xff]  }
  0x94   : > { %1593 = vmatpush1.bf16.msra.mxu0 %v2570_v21  ;;  %v2612_v49 = vld [vmem:[%s3276_s8 + $0xd0] ss:$8 sps:$4 sm:$0xff]   ;;  %v2614_v51 = vld [vmem:[%s3276_s8 + $0xc4] ss:$8 sps:$4 sm:$0xff]   ;;  %v2618_v53 = vld [vmem:[%s3276_s8 + $0xc0] ss:$8 sps:$4 sm:$0xff]  }
  0x95   : > { %1636 = vmatpush1.bf16.msra.mxu1 %v2571_v22  ;;  %1594 = vmatprep.subr.bf16.mxu0 %v2572_v23  ;;  %v2613_v50 = vld [vmem:[%s3276_s8 + $0x1d0] ss:$8 sps:$4 sm:$0xff]   ;;  %v2616_v52 = vld [vmem:[%s3276_s8 + $0x1c4] ss:$8 sps:$4 sm:$0xff]   ;;  %v2619_v54 = vld [vmem:[%s3276_s8 + $0x1c0] ss:$8 sps:$4 sm:$0xff]  }
  0x96   : > { %1637 = vmatprep.subr.bf16.mxu1 %v2574_v24  ;;  %v2620_v55 = vld [vmem:[%s3276_s8 + $0xb4] ss:$8 sps:$4 sm:$0xff]   ;;  %v2624_v59 = vld [vmem:[%s3276_s8 + $0xb0] ss:$8 sps:$4 sm:$0xff]   ;;  %v2626_v61 = vld [vmem:[%s3276_s8 + $0xa4] ss:$8 sps:$4 sm:$0xff]  }
  0x97   : > { %v2646_v56 = vld [vmem:[%s3269_s29 + $0x4] ss:$48 sps:$4 sm:$0xff]   ;;  %v2649_v58 = vld [vmem:[%s3269_s29 + $0xc] ss:$48 sps:$4 sm:$0xff]   ;;  %v2625_v60 = vld [vmem:[%s3276_s8 + $0x1b0] ss:$8 sps:$4 sm:$0xff]  }
  0x98   : > { %1595 = vmatpush1.bf16.msra.mxu0 %v2576_v25  ;;  %v2622_v57 = vld [vmem:[%s3276_s8 + $0x1b4] ss:$8 sps:$4 sm:$0xff]   ;;  %1618 = vmatprep.mubr.bf16.mxu0 %v2646_v56  ;;  %v2628_v62 = vld [vmem:[%s3276_s8 + $0x1a4] ss:$8 sps:$4 sm:$0xff]   ;;  %v2630_v63 = vld [vmem:[%s3276_s8 + $0xa0] ss:$8 sps:$4 sm:$0xff]  }
  0x99   : > { %1638 = vmatpush1.bf16.msra.mxu1 %v2577_v26  ;;  %1596 = vmatprep.subr.bf16.mxu0 %v2578_v27  ;;  %v2631_v0 = vld [vmem:[%s3276_s8 + $0x1a0] ss:$8 sps:$4 sm:$0xff]   ;;  %v2632_v1 = vld [vmem:[%s3276_s8 + $0x94] ss:$8 sps:$4 sm:$0xff]   ;;  %v2636_v3 = vld [vmem:[%s3276_s8 + $0x90] ss:$8 sps:$4 sm:$0xff]  }
  0x9a   : > { %1639 = vmatprep.subr.bf16.mxu1 %v2580_v28  ;;  %1661 = vmatprep.mubr.bf16.mxu1 %v2649_v58  ;;  %v2634_v2 = vld [vmem:[%s3276_s8 + $0x194] ss:$8 sps:$4 sm:$0xff]   ;;  %v2637_v4 = vld [vmem:[%s3276_s8 + $0x190] ss:$8 sps:$4 sm:$0xff]   ;;  %v2638_v5 = vld [vmem:[%s3276_s8 + $0x84] ss:$8 sps:$4 sm:$0xff]  }
  0x9b   : > { %v2640_v6 = vld [vmem:[%s3276_s8 + $0x184] ss:$8 sps:$4 sm:$0xff]   ;;  %v2642_v7 = vld [vmem:[%s3276_s8 + $0x80] ss:$8 sps:$4 sm:$0xff]   ;;  %v2652_v9 = vld [vmem:[%s3276_s8 + $0x274] ss:$8 sps:$4 sm:$0xff]  }
  0x9c   : > { %1597 = vmatpush1.bf16.msra.mxu0 %v2582_v29  ;;  %v2643_v8 = vld [vmem:[%s3276_s8 + $0x180] ss:$8 sps:$4 sm:$0xff]   ;;  %v2655_v10 = vld [vmem:[%s3276_s8 + $0x374] ss:$8 sps:$4 sm:$0xff]   ;;  %v2650_v13 = vld [vmem:[%s3276_s8 + $0x270] ss:$8 sps:$4 sm:$0xff]  }
  0x9d   : > { %1640 = vmatpush1.bf16.msra.mxu1 %v2583_v30  ;;  %1598 = vmatprep.subr.bf16.mxu0 %v2584_v31  ;;  %v2644_v11 = vld [vmem:[%s3269_s29] ss:$48 sps:$4 sm:$0xff]   ;;  %v2647_v12 = vld [vmem:[%s3269_s29 + $0x8] ss:$48 sps:$4 sm:$0xff]   ;;  %v2658_v15 = vld [vmem:[%s3276_s8 + $0x264] ss:$8 sps:$4 sm:$0xff]  }
  0x9e   : > { %1641 = vmatprep.subr.bf16.mxu1 %v2586_v32  ;;  %v2653_v14 = vld [vmem:[%s3276_s8 + $0x370] ss:$8 sps:$4 sm:$0xff]   ;;  %v2661_v16 = vld [vmem:[%s3276_s8 + $0x364] ss:$8 sps:$4 sm:$0xff]   ;;  %v2656_v17 = vld [vmem:[%s3276_s8 + $0x260] ss:$8 sps:$4 sm:$0xff]  }
  0x9f   : > { %v2659_v18 = vld [vmem:[%s3276_s8 + $0x360] ss:$8 sps:$4 sm:$0xff]   ;;  %v2664_v19 = vld [vmem:[%s3276_s8 + $0x254] ss:$8 sps:$4 sm:$0xff]   ;;  %v2662_v21 = vld [vmem:[%s3276_s8 + $0x250] ss:$8 sps:$4 sm:$0xff]  }
  0xa0   : > { %1599 = vmatpush1.bf16.msra.mxu0 %v2588_v33  ;;  %v2667_v20 = vld [vmem:[%s3276_s8 + $0x354] ss:$8 sps:$4 sm:$0xff]   ;;  %v2665_v22 = vld [vmem:[%s3276_s8 + $0x350] ss:$8 sps:$4 sm:$0xff]   ;;  %v2670_v23 = vld [vmem:[%s3276_s8 + $0x244] ss:$8 sps:$4 sm:$0xff]  }
  0xa1   : > { %1642 = vmatpush1.bf16.msra.mxu1 %v2589_v34  ;;  %1600 = vmatprep.subr.bf16.mxu0 %v2590_v35  ;;  %v2673_v24 = vld [vmem:[%s3276_s8 + $0x344] ss:$8 sps:$4 sm:$0xff]   ;;  %v2668_v25 = vld [vmem:[%s3276_s8 + $0x240] ss:$8 sps:$4 sm:$0xff]   ;;  %v2676_v27 = vld [vmem:[%s3276_s8 + $0x234] ss:$8 sps:$4 sm:$0xff]  }
  0xa2   : > { %1643 = vmatprep.subr.bf16.mxu1 %v2592_v36  ;;  %v2671_v26 = vld [vmem:[%s3276_s8 + $0x340] ss:$8 sps:$4 sm:$0xff]   ;;  %v2679_v28 = vld [vmem:[%s3276_s8 + $0x334] ss:$8 sps:$4 sm:$0xff]   ;;  %v2674_v29 = vld [vmem:[%s3276_s8 + $0x230] ss:$8 sps:$4 sm:$0xff]  }
  0xa3   : > { %v2677_v30 = vld [vmem:[%s3276_s8 + $0x330] ss:$8 sps:$4 sm:$0xff]   ;;  %v2682_v31 = vld [vmem:[%s3276_s8 + $0x224] ss:$8 sps:$4 sm:$0xff]   ;;  %v2680_v33 = vld [vmem:[%s3276_s8 + $0x220] ss:$8 sps:$4 sm:$0xff]  }
  0xa4   : > { %1601 = vmatpush1.bf16.msra.mxu0 %v2594_v37  ;;  %v2685_v32 = vld [vmem:[%s3276_s8 + $0x324] ss:$8 sps:$4 sm:$0xff]   ;;  %v2683_v34 = vld [vmem:[%s3276_s8 + $0x320] ss:$8 sps:$4 sm:$0xff]   ;;  %v2688_v35 = vld [vmem:[%s3276_s8 + $0x214] ss:$8 sps:$4 sm:$0xff]  }
  0xa5   : > { %1644 = vmatpush1.bf16.msra.mxu1 %v2595_v38  ;;  %1602 = vmatprep.subr.bf16.mxu0 %v2596_v39  ;;  %v2691_v36 = vld [vmem:[%s3276_s8 + $0x314] ss:$8 sps:$4 sm:$0xff]   ;;  %v2686_v37 = vld [vmem:[%s3276_s8 + $0x210] ss:$8 sps:$4 sm:$0xff]   ;;  %v2694_v39 = vld [vmem:[%s3276_s8 + $0x204] ss:$8 sps:$4 sm:$0xff]  }
  0xa6   : > { %1645 = vmatprep.subr.bf16.mxu1 %v2598_v40  ;;  %v2689_v38 = vld [vmem:[%s3276_s8 + $0x310] ss:$8 sps:$4 sm:$0xff]   ;;  %v2697_v40 = vld [vmem:[%s3276_s8 + $0x304] ss:$8 sps:$4 sm:$0xff]   ;;  %p2389_p7 = scmp.ne.s32.totalorder %s3086_s21, 1 }
  0xa7   : > { %v2713_v56 = vld [vmem:[%s3276_s8 + $0x3d0] ss:$8 sps:$4 sm:$0xff]   ;;  %v2721_v58 = vld [vmem:[%s3276_s8 + $0x3c4] ss:$8 sps:$4 sm:$0xff]  }
  0xa8   : > { %1603 = vmatpush2.bf16.msra.mxu0 %v2600_v41  ;;  %v2748_v41 = vld [vmem:[%s3269_s29 + $0x14] ss:$48 sps:$4 sm:$0xff]  }
  0xa9   : > { %1646 = vmatpush2.bf16.msra.mxu1 %v2601_v42  ;;  %1604 = vmatprep.subr.bf16.mxu0 %v2602_v43  ;;  %v2751_v42 = vld [vmem:[%s3269_s29 + $0x1c] ss:$48 sps:$4 sm:$0xff]   ;;  %v2692_v43 = vld [vmem:[%s3276_s8 + $0x200] ss:$8 sps:$4 sm:$0xff]  }
  0xaa   : > { %1647 = vmatprep.subr.bf16.mxu1 %v2604_v44  ;;  %v2695_v44 = vld [vmem:[%s3276_s8 + $0x300] ss:$8 sps:$4 sm:$0xff]  }
  0xac   : > { %1605 = vmatpush2.bf16.msra.mxu0 %v2606_v45  ;;  %v2700_v45 = vld [vmem:[%s3276_s8 + $0x2f4] ss:$8 sps:$4 sm:$0xff]  }
  0xad   : > { %1648 = vmatpush2.bf16.msra.mxu1 %v2607_v46  ;;  %1606 = vmatprep.subr.bf16.mxu0 %v2608_v47  ;;  %v2703_v46 = vld [vmem:[%s3276_s8 + $0x3f4] ss:$8 sps:$4 sm:$0xff]   ;;  %v2698_v47 = vld [vmem:[%s3276_s8 + $0x2f0] ss:$8 sps:$4 sm:$0xff]  }
  0xae   : > { %1649 = vmatprep.subr.bf16.mxu1 %v2610_v48  ;;  %v2701_v48 = vld [vmem:[%s3276_s8 + $0x3f0] ss:$8 sps:$4 sm:$0xff]  }
  0xb0   : > { %1607 = vmatpush2.bf16.msra.mxu0 %v2612_v49  ;;  %v2706_v49 = vld [vmem:[%s3276_s8 + $0x2e4] ss:$8 sps:$4 sm:$0xff]  }
  0xb1   : > { %1650 = vmatpush2.bf16.msra.mxu1 %v2613_v50  ;;  %1608 = vmatprep.subr.bf16.mxu0 %v2614_v51  ;;  %v2709_v50 = vld [vmem:[%s3276_s8 + $0x3e4] ss:$8 sps:$4 sm:$0xff]   ;;  %v2704_v51 = vld [vmem:[%s3276_s8 + $0x2e0] ss:$8 sps:$4 sm:$0xff]  }
  0xb2   : > { %1651 = vmatprep.subr.bf16.mxu1 %v2616_v52  ;;  %v2707_v52 = vld [vmem:[%s3276_s8 + $0x3e0] ss:$8 sps:$4 sm:$0xff]  }
  0xb4   : > { %1609 = vmatpush2.bf16.msra.mxu0 %v2618_v53  ;;  %v2712_v53 = vld [vmem:[%s3276_s8 + $0x2d4] ss:$8 sps:$4 sm:$0xff]  }
  0xb5   : > { %1652 = vmatpush2.bf16.msra.mxu1 %v2619_v54  ;;  %1610 = vmatprep.subr.bf16.mxu0 %v2620_v55  ;;  %v2715_v54 = vld [vmem:[%s3276_s8 + $0x3d4] ss:$8 sps:$4 sm:$0xff]   ;;  %v2710_v55 = vld [vmem:[%s3276_s8 + $0x2d0] ss:$8 sps:$4 sm:$0xff]  }
  0xb6   : > { %1653 = vmatprep.subr.bf16.mxu1 %v2622_v57  ;;  %v2718_v57 = vld [vmem:[%s3276_s8 + $0x2c4] ss:$8 sps:$4 sm:$0xff]  }
  0xb8   : > { %1611 = vmatpush2.bf16.msra.mxu0 %v2624_v59  ;;  %v2716_v59 = vld [vmem:[%s3276_s8 + $0x2c0] ss:$8 sps:$4 sm:$0xff]  }
  0xb9   : > { %1654 = vmatpush2.bf16.msra.mxu1 %v2625_v60  ;;  %1612 = vmatprep.subr.bf16.mxu0 %v2626_v61  ;;  %v2719_v60 = vld [vmem:[%s3276_s8 + $0x3c0] ss:$8 sps:$4 sm:$0xff]   ;;  %v2724_v61 = vld [vmem:[%s3276_s8 + $0x2b4] ss:$8 sps:$4 sm:$0xff]  }
  0xba   : > { %1655 = vmatprep.subr.bf16.mxu1 %v2628_v62  ;;  %v2727_v62 = vld [vmem:[%s3276_s8 + $0x3b4] ss:$8 sps:$4 sm:$0xff]  }
  0xbc   : > { %1613 = vmatpush2.bf16.msra.mxu0 %v2630_v63  ;;  %v2722_v63 = vld [vmem:[%s3276_s8 + $0x2b0] ss:$8 sps:$4 sm:$0xff]  }
  0xbd   : > { %1656 = vmatpush2.bf16.msra.mxu1 %v2631_v0  ;;  %1614 = vmatprep.subr.bf16.mxu0 %v2632_v1  ;;  %v2725_v0 = vld [vmem:[%s3276_s8 + $0x3b0] ss:$8 sps:$4 sm:$0xff]   ;;  %v2730_v1 = vld [vmem:[%s3276_s8 + $0x2a4] ss:$8 sps:$4 sm:$0xff]  }
  0xbe   : > { %1657 = vmatprep.subr.bf16.mxu1 %v2634_v2  ;;  %v2733_v2 = vld [vmem:[%s3276_s8 + $0x3a4] ss:$8 sps:$4 sm:$0xff]  }
  0xc0   : > { %1615 = vmatpush2.bf16.msra.mxu0 %v2636_v3  ;;  %v2728_v3 = vld [vmem:[%s3276_s8 + $0x2a0] ss:$8 sps:$4 sm:$0xff]  }
  0xc1   : > { %1658 = vmatpush2.bf16.msra.mxu1 %v2637_v4  ;;  %1616 = vmatprep.subr.bf16.mxu0 %v2638_v5  ;;  %v2731_v4 = vld [vmem:[%s3276_s8 + $0x3a0] ss:$8 sps:$4 sm:$0xff]   ;;  %v2736_v5 = vld [vmem:[%s3276_s8 + $0x294] ss:$8 sps:$4 sm:$0xff]  }
  0xc2   : > { %1659 = vmatprep.subr.bf16.mxu1 %v2640_v6  ;;  %v2739_v6 = vld [vmem:[%s3276_s8 + $0x394] ss:$8 sps:$4 sm:$0xff]  }
  0xc4   : > { %1617 = vmatpush2.bf16.msra.mxu0 %v2642_v7  ;;  %v2734_v7 = vld [vmem:[%s3276_s8 + $0x290] ss:$8 sps:$4 sm:$0xff]  }
  0xc5   : > { %1660 = vmatpush2.bf16.msra.mxu1 %v2643_v8  ;;  %1672 = vmatprep.subr.bf16.mxu0 %v2652_v9  ;;  %v2737_v8 = vld [vmem:[%s3276_s8 + $0x390] ss:$8 sps:$4 sm:$0xff]   ;;  %v2742_v9 = vld [vmem:[%s3276_s8 + $0x284] ss:$8 sps:$4 sm:$0xff]  }
  0xc6   : > { %1715 = vmatprep.subr.bf16.mxu1 %v2655_v10  ;;  %v2745_v10 = vld [vmem:[%s3276_s8 + $0x384] ss:$8 sps:$4 sm:$0xff]  }
  0xc7   : > { %1619 = vmatmul.mubr.bf16.vlgmr.msra.gmra.mxu0 %v2644_v11  ;;  %v2740_v11 = vld [vmem:[%s3276_s8 + $0x280] ss:$8 sps:$4 sm:$0xff]  }
  0xc8   : > { %1662 = vmatmul.mubr.bf16.vlgmr.msra.gmra.mxu1 %v2647_v12  ;;  %1673 = vmatpush1.bf16.msra.mxu0 %v2650_v13  ;;  %v2743_v12 = vld [vmem:[%s3276_s8 + $0x380] ss:$8 sps:$4 sm:$0xff]   ;;  %v2754_v13 = vld [vmem:[%s3276_s8 + $0x474] ss:$8 sps:$4 sm:$0xff]  }
  0xc9   : > { %1716 = vmatpush1.bf16.msra.mxu1 %v2653_v14  ;;  %1674 = vmatprep.subr.bf16.mxu0 %v2658_v15  ;;  %v2757_v14 = vld [vmem:[%s3276_s8 + $0x574] ss:$8 sps:$4 sm:$0xff]   ;;  %v2746_v15 = vld [vmem:[%s3269_s29 + $0x10] ss:$48 sps:$4 sm:$0xff]  }
  0xca   : > { %1717 = vmatprep.subr.bf16.mxu1 %v2661_v16  ;;  %1704 = vmatprep.mubr.bf16.mxu0 %v2748_v41  ;;  %v2749_v16 = vld [vmem:[%s3269_s29 + $0x18] ss:$48 sps:$4 sm:$0xff]   ;;  %v2790_v41 = vld [vmem:[%s3276_s8 + $0x414] ss:$8 sps:$4 sm:$0xff]  }
  0xcb   : > { %1747 = vmatprep.mubr.bf16.mxu1 %v2751_v42  ;;  %v2793_v42 = vld [vmem:[%s3276_s8 + $0x514] ss:$8 sps:$4 sm:$0xff]  }
  0xcc   : > { %1675 = vmatpush1.bf16.msra.mxu0 %v2656_v17  ;;  %v2752_v17 = vld [vmem:[%s3276_s8 + $0x470] ss:$8 sps:$4 sm:$0xff]  }
  0xcd   : > { %1718 = vmatpush1.bf16.msra.mxu1 %v2659_v18  ;;  %1676 = vmatprep.subr.bf16.mxu0 %v2664_v19  ;;  %v2755_v18 = vld [vmem:[%s3276_s8 + $0x570] ss:$8 sps:$4 sm:$0xff]   ;;  %v2760_v19 = vld [vmem:[%s3276_s8 + $0x464] ss:$8 sps:$4 sm:$0xff]  }
  0xce   : > { %1719 = vmatprep.subr.bf16.mxu1 %v2667_v20  ;;  %v2763_v20 = vld [vmem:[%s3276_s8 + $0x564] ss:$8 sps:$4 sm:$0xff]  }
  0xd0   : > { %1677 = vmatpush1.bf16.msra.mxu0 %v2662_v21  ;;  %v2758_v21 = vld [vmem:[%s3276_s8 + $0x460] ss:$8 sps:$4 sm:$0xff]  }
  0xd1   : > { %1720 = vmatpush1.bf16.msra.mxu1 %v2665_v22  ;;  %1678 = vmatprep.subr.bf16.mxu0 %v2670_v23  ;;  %v2761_v22 = vld [vmem:[%s3276_s8 + $0x560] ss:$8 sps:$4 sm:$0xff]   ;;  %v2766_v23 = vld [vmem:[%s3276_s8 + $0x454] ss:$8 sps:$4 sm:$0xff]  }
  0xd2   : > { %1721 = vmatprep.subr.bf16.mxu1 %v2673_v24  ;;  %v2769_v24 = vld [vmem:[%s3276_s8 + $0x554] ss:$8 sps:$4 sm:$0xff]  }
  0xd4   : > { %1679 = vmatpush1.bf16.msra.mxu0 %v2668_v25  ;;  %v2850_v25 = vld [vmem:[%s3269_s29 + $0x24] ss:$48 sps:$4 sm:$0xff]  }
  0xd5   : > { %1722 = vmatpush1.bf16.msra.mxu1 %v2671_v26  ;;  %1680 = vmatprep.subr.bf16.mxu0 %v2676_v27  ;;  %v2853_v26 = vld [vmem:[%s3269_s29 + $0x2c] ss:$48 sps:$4 sm:$0xff]   ;;  %v2764_v27 = vld [vmem:[%s3276_s8 + $0x450] ss:$8 sps:$4 sm:$0xff]  }
  0xd6   : > { %1723 = vmatprep.subr.bf16.mxu1 %v2679_v28  ;;  %v2767_v28 = vld [vmem:[%s3276_s8 + $0x550] ss:$8 sps:$4 sm:$0xff]  }
  0xd8   : > { %1681 = vmatpush1.bf16.msra.mxu0 %v2674_v29  ;;  %v2772_v29 = vld [vmem:[%s3276_s8 + $0x444] ss:$8 sps:$4 sm:$0xff]  }
  0xd9   : > { %1724 = vmatpush1.bf16.msra.mxu1 %v2677_v30  ;;  %1682 = vmatprep.subr.bf16.mxu0 %v2682_v31  ;;  %v2775_v30 = vld [vmem:[%s3276_s8 + $0x544] ss:$8 sps:$4 sm:$0xff]   ;;  %v2770_v31 = vld [vmem:[%s3276_s8 + $0x440] ss:$8 sps:$4 sm:$0xff]  }
  0xda   : > { %1725 = vmatprep.subr.bf16.mxu1 %v2685_v32  ;;  %v2773_v32 = vld [vmem:[%s3276_s8 + $0x540] ss:$8 sps:$4 sm:$0xff]  }
  0xdc   : > { %1683 = vmatpush1.bf16.msra.mxu0 %v2680_v33  ;;  %v2778_v33 = vld [vmem:[%s3276_s8 + $0x434] ss:$8 sps:$4 sm:$0xff]  }
  0xdd   : > { %1726 = vmatpush1.bf16.msra.mxu1 %v2683_v34  ;;  %1684 = vmatprep.subr.bf16.mxu0 %v2688_v35  ;;  %v2781_v34 = vld [vmem:[%s3276_s8 + $0x534] ss:$8 sps:$4 sm:$0xff]   ;;  %v2776_v35 = vld [vmem:[%s3276_s8 + $0x430] ss:$8 sps:$4 sm:$0xff]  }
  0xde   : > { %1727 = vmatprep.subr.bf16.mxu1 %v2691_v36  ;;  %v2779_v36 = vld [vmem:[%s3276_s8 + $0x530] ss:$8 sps:$4 sm:$0xff]  }
  0xe0   : > { %1685 = vmatpush1.bf16.msra.mxu0 %v2686_v37  ;;  %v2784_v37 = vld [vmem:[%s3276_s8 + $0x424] ss:$8 sps:$4 sm:$0xff]  }
  0xe1   : > { %1728 = vmatpush1.bf16.msra.mxu1 %v2689_v38  ;;  %1686 = vmatprep.subr.bf16.mxu0 %v2694_v39  ;;  %v2787_v38 = vld [vmem:[%s3276_s8 + $0x524] ss:$8 sps:$4 sm:$0xff]   ;;  %v2782_v39 = vld [vmem:[%s3276_s8 + $0x420] ss:$8 sps:$4 sm:$0xff]  }
  0xe2   : > { %1729 = vmatprep.subr.bf16.mxu1 %v2697_v40  ;;  %v2785_v40 = vld [vmem:[%s3276_s8 + $0x520] ss:$8 sps:$4 sm:$0xff]  }
  0xe4   : > { %1687 = vmatpush1.bf16.msra.mxu0 %v2692_v43  ;;  %v2788_v43 = vld [vmem:[%s3276_s8 + $0x410] ss:$8 sps:$4 sm:$0xff]  }
  0xe5   : > { %1730 = vmatpush1.bf16.msra.mxu1 %v2695_v44  ;;  %1688 = vmatprep.subr.bf16.mxu0 %v2700_v45  ;;  %v2791_v44 = vld [vmem:[%s3276_s8 + $0x510] ss:$8 sps:$4 sm:$0xff]   ;;  %v2796_v45 = vld [vmem:[%s3276_s8 + $0x404] ss:$8 sps:$4 sm:$0xff]  }
  0xe6   : > { %1731 = vmatprep.subr.bf16.mxu1 %v2703_v46  ;;  %v2799_v46 = vld [vmem:[%s3276_s8 + $0x504] ss:$8 sps:$4 sm:$0xff]  }
  0xe8   : > { %1689 = vmatpush2.bf16.msra.mxu0 %v2698_v47  ;;  %v2794_v47 = vld [vmem:[%s3276_s8 + $0x400] ss:$8 sps:$4 sm:$0xff]  }
  0xe9   : > { %1732 = vmatpush2.bf16.msra.mxu1 %v2701_v48  ;;  %1690 = vmatprep.subr.bf16.mxu0 %v2706_v49  ;;  %v2797_v48 = vld [vmem:[%s3276_s8 + $0x500] ss:$8 sps:$4 sm:$0xff]   ;;  %v2802_v49 = vld [vmem:[%s3276_s8 + $0x4f4] ss:$8 sps:$4 sm:$0xff]  }
  0xea   : > { %1733 = vmatprep.subr.bf16.mxu1 %v2709_v50  ;;  %v2805_v50 = vld [vmem:[%s3276_s8 + $0x5f4] ss:$8 sps:$4 sm:$0xff]  }
  0xec   : > { %1691 = vmatpush2.bf16.msra.mxu0 %v2704_v51  ;;  %v2800_v51 = vld [vmem:[%s3276_s8 + $0x4f0] ss:$8 sps:$4 sm:$0xff]  }
  0xed   : > { %1734 = vmatpush2.bf16.msra.mxu1 %v2707_v52  ;;  %1692 = vmatprep.subr.bf16.mxu0 %v2712_v53  ;;  %v2803_v52 = vld [vmem:[%s3276_s8 + $0x5f0] ss:$8 sps:$4 sm:$0xff]   ;;  %v2808_v53 = vld [vmem:[%s3276_s8 + $0x4e4] ss:$8 sps:$4 sm:$0xff]  }
  0xee   : > { %1735 = vmatprep.subr.bf16.mxu1 %v2715_v54  ;;  %v2811_v54 = vld [vmem:[%s3276_s8 + $0x5e4] ss:$8 sps:$4 sm:$0xff]  }
  0xf0   : > { %1693 = vmatpush2.bf16.msra.mxu0 %v2710_v55  ;;  %v2806_v55 = vld [vmem:[%s3276_s8 + $0x4e0] ss:$8 sps:$4 sm:$0xff]  }
  0xf1   : > { %1736 = vmatpush2.bf16.msra.mxu1 %v2713_v56  ;;  %1694 = vmatprep.subr.bf16.mxu0 %v2718_v57  ;;  %v2809_v56 = vld [vmem:[%s3276_s8 + $0x5e0] ss:$8 sps:$4 sm:$0xff]   ;;  %v2814_v57 = vld [vmem:[%s3276_s8 + $0x4d4] ss:$8 sps:$4 sm:$0xff]  }
  0xf2   : > { %1737 = vmatprep.subr.bf16.mxu1 %v2721_v58  ;;  %v2817_v58 = vld [vmem:[%s3276_s8 + $0x5d4] ss:$8 sps:$4 sm:$0xff]  }
  0xf4   : > { %1695 = vmatpush2.bf16.msra.mxu0 %v2716_v59  ;;  %v2812_v59 = vld [vmem:[%s3276_s8 + $0x4d0] ss:$8 sps:$4 sm:$0xff]  }
  0xf5   : > { %1738 = vmatpush2.bf16.msra.mxu1 %v2719_v60  ;;  %1696 = vmatprep.subr.bf16.mxu0 %v2724_v61  ;;  %v2815_v60 = vld [vmem:[%s3276_s8 + $0x5d0] ss:$8 sps:$4 sm:$0xff]   ;;  %v2820_v61 = vld [vmem:[%s3276_s8 + $0x4c4] ss:$8 sps:$4 sm:$0xff]  }
  0xf6   : > { %1739 = vmatprep.subr.bf16.mxu1 %v2727_v62  ;;  %v2823_v62 = vld [vmem:[%s3276_s8 + $0x5c4] ss:$8 sps:$4 sm:$0xff]  }
  0xf8   : > { %1697 = vmatpush2.bf16.msra.mxu0 %v2722_v63  ;;  %v2818_v63 = vld [vmem:[%s3276_s8 + $0x4c0] ss:$8 sps:$4 sm:$0xff]  }
  0xf9   : > { %1740 = vmatpush2.bf16.msra.mxu1 %v2725_v0  ;;  %1698 = vmatprep.subr.bf16.mxu0 %v2730_v1  ;;  %v2821_v0 = vld [vmem:[%s3276_s8 + $0x5c0] ss:$8 sps:$4 sm:$0xff]   ;;  %v2826_v1 = vld [vmem:[%s3276_s8 + $0x4b4] ss:$8 sps:$4 sm:$0xff]  }
  0xfa   : > { %1741 = vmatprep.subr.bf16.mxu1 %v2733_v2  ;;  %v2829_v2 = vld [vmem:[%s3276_s8 + $0x5b4] ss:$8 sps:$4 sm:$0xff]  }
  0xfc   : > { %1699 = vmatpush2.bf16.msra.mxu0 %v2728_v3  ;;  %v2824_v3 = vld [vmem:[%s3276_s8 + $0x4b0] ss:$8 sps:$4 sm:$0xff]  }
  0xfd   : > { %1742 = vmatpush2.bf16.msra.mxu1 %v2731_v4  ;;  %1700 = vmatprep.subr.bf16.mxu0 %v2736_v5  ;;  %v2827_v4 = vld [vmem:[%s3276_s8 + $0x5b0] ss:$8 sps:$4 sm:$0xff]   ;;  %v2832_v5 = vld [vmem:[%s3276_s8 + $0x4a4] ss:$8 sps:$4 sm:$0xff]  }
  0xfe   : > { %1743 = vmatprep.subr.bf16.mxu1 %v2739_v6  ;;  %v2835_v6 = vld [vmem:[%s3276_s8 + $0x5a4] ss:$8 sps:$4 sm:$0xff]  }
 0x100   : > { %1701 = vmatpush2.bf16.msra.mxu0 %v2734_v7  ;;  %v2830_v7 = vld [vmem:[%s3276_s8 + $0x4a0] ss:$8 sps:$4 sm:$0xff]  }
 0x101   : > { %1744 = vmatpush2.bf16.msra.mxu1 %v2737_v8  ;;  %1702 = vmatprep.subr.bf16.mxu0 %v2742_v9  ;;  %v2833_v8 = vld [vmem:[%s3276_s8 + $0x5a0] ss:$8 sps:$4 sm:$0xff]   ;;  %v2838_v9 = vld [vmem:[%s3276_s8 + $0x494] ss:$8 sps:$4 sm:$0xff]  }
 0x102   : > { %1745 = vmatprep.subr.bf16.mxu1 %v2745_v10  ;;  %v2841_v10 = vld [vmem:[%s3276_s8 + $0x594] ss:$8 sps:$4 sm:$0xff]  }
 0x104   : > { %1703 = vmatpush2.bf16.msra.mxu0 %v2740_v11  ;;  %v2836_v11 = vld [vmem:[%s3276_s8 + $0x490] ss:$8 sps:$4 sm:$0xff]  }
 0x105   : > { %1746 = vmatpush2.bf16.msra.mxu1 %v2743_v12  ;;  %1758 = vmatprep.subr.bf16.mxu0 %v2754_v13  ;;  %v2839_v12 = vld [vmem:[%s3276_s8 + $0x590] ss:$8 sps:$4 sm:$0xff]   ;;  %v2844_v13 = vld [vmem:[%s3276_s8 + $0x484] ss:$8 sps:$4 sm:$0xff]  }
 0x106   : > { %1801 = vmatprep.subr.bf16.mxu1 %v2757_v14  ;;  %v2847_v14 = vld [vmem:[%s3276_s8 + $0x584] ss:$8 sps:$4 sm:$0xff]  }
 0x107   : > { %1705 = vmatmul.mubr.bf16.vlgmr.msra.gmra.mxu0 %v2746_v15  ;;  %v2842_v15 = vld [vmem:[%s3276_s8 + $0x480] ss:$8 sps:$4 sm:$0xff]  }
 0x108   : > { %1748 = vmatmul.mubr.bf16.vlgmr.msra.gmra.mxu1 %v2749_v16  ;;  %1759 = vmatpush1.bf16.msra.mxu0 %v2752_v17  ;;  %v2845_v16 = vld [vmem:[%s3276_s8 + $0x580] ss:$8 sps:$4 sm:$0xff]  }
 0x109   : > { %1802 = vmatpush1.bf16.msra.mxu1 %v2755_v18  ;;  %1760 = vmatprep.subr.bf16.mxu0 %v2760_v19  ;;  %v2848_v17 = vld [vmem:[%s3269_s29 + $0x20] ss:$48 sps:$4 sm:$0xff]   ;;  %v2851_v18 = vld [vmem:[%s3269_s29 + $0x28] ss:$48 sps:$4 sm:$0xff]  }
 0x10a   : > { %1803 = vmatprep.subr.bf16.mxu1 %v2763_v20  ;;  %1790 = vmatprep.mubr.bf16.mxu0 %v2850_v25 }
 0x10b   : > { %1833 = vmatprep.mubr.bf16.mxu1 %v2853_v26 }
 0x10c   : > { %1761 = vmatpush1.bf16.msra.mxu0 %v2758_v21 }
 0x10d   : > { %1804 = vmatpush1.bf16.msra.mxu1 %v2761_v22  ;;  %1762 = vmatprep.subr.bf16.mxu0 %v2766_v23 }
 0x10e   : > { %1805 = vmatprep.subr.bf16.mxu1 %v2769_v24 }
 0x110   : > { %1763 = vmatpush1.bf16.msra.mxu0 %v2764_v27 }
 0x111   : > { %1806 = vmatpush1.bf16.msra.mxu1 %v2767_v28  ;;  %1764 = vmatprep.subr.bf16.mxu0 %v2772_v29 }
 0x112   : > { %1807 = vmatprep.subr.bf16.mxu1 %v2775_v30 }
 0x114   : > { %1765 = vmatpush1.bf16.msra.mxu0 %v2770_v31 }
 0x115   : > { %1808 = vmatpush1.bf16.msra.mxu1 %v2773_v32  ;;  %1766 = vmatprep.subr.bf16.mxu0 %v2778_v33 }
 0x116   : > { %1809 = vmatprep.subr.bf16.mxu1 %v2781_v34 }
 0x118   : > { %1767 = vmatpush1.bf16.msra.mxu0 %v2776_v35 }
 0x119   : > { %1810 = vmatpush1.bf16.msra.mxu1 %v2779_v36  ;;  %1768 = vmatprep.subr.bf16.mxu0 %v2784_v37 }
 0x11a   : > { %1811 = vmatprep.subr.bf16.mxu1 %v2787_v38 }
 0x11c   : > { %1769 = vmatpush1.bf16.msra.mxu0 %v2782_v39 }
 0x11d   : > { %1812 = vmatpush1.bf16.msra.mxu1 %v2785_v40  ;;  %1770 = vmatprep.subr.bf16.mxu0 %v2790_v41 }
 0x11e   : > { %1813 = vmatprep.subr.bf16.mxu1 %v2793_v42 }
 0x120   : > { %1771 = vmatpush1.bf16.msra.mxu0 %v2788_v43 }
 0x121   : > { %1814 = vmatpush1.bf16.msra.mxu1 %v2791_v44  ;;  %1772 = vmatprep.subr.bf16.mxu0 %v2796_v45 }
 0x122   : > { %1815 = vmatprep.subr.bf16.mxu1 %v2799_v46 }
 0x124   : > { %1773 = vmatpush1.bf16.msra.mxu0 %v2794_v47 }
 0x125   : > { %1816 = vmatpush1.bf16.msra.mxu1 %v2797_v48  ;;  %1774 = vmatprep.subr.bf16.mxu0 %v2802_v49  ;;  %v358_v48 = vld [vmem:[#allocation2 + $0x10] sm:$0xff] }
 0x126   : > { %1817 = vmatprep.subr.bf16.mxu1 %v2805_v50 }
 0x128   : > { %1775 = vmatpush2.bf16.msra.mxu0 %v2800_v51 }
 0x129   : > { %1818 = vmatpush2.bf16.msra.mxu1 %v2803_v52  ;;  %1776 = vmatprep.subr.bf16.mxu0 %v2808_v53 }
 0x12a   : > { %1819 = vmatprep.subr.bf16.mxu1 %v2811_v54  ;;  %v359_v54 = vld [vmem:[#allocation2] sm:$0xff] }
 0x12c   : > { %1777 = vmatpush2.bf16.msra.mxu0 %v2806_v55 }
 0x12d   : > { %1820 = vmatpush2.bf16.msra.mxu1 %v2809_v56  ;;  %1778 = vmatprep.subr.bf16.mxu0 %v2814_v57 }
 0x12e   : > { %1821 = vmatprep.subr.bf16.mxu1 %v2817_v58 }
 0x130   : > { %1779 = vmatpush2.bf16.msra.mxu0 %v2812_v59 }
 0x131   : > { %1822 = vmatpush2.bf16.msra.mxu1 %v2815_v60  ;;  %1780 = vmatprep.subr.bf16.mxu0 %v2820_v61  ;;  %v360_v61 = vld [vmem:[#allocation2 + $0x18] sm:$0xff] }
 0x132   : > { %1823 = vmatprep.subr.bf16.mxu1 %v2823_v62 }
 0x134   : > { %1781 = vmatpush2.bf16.msra.mxu0 %v2818_v63 }
 0x135   : > { %1824 = vmatpush2.bf16.msra.mxu1 %v2821_v0  ;;  %1782 = vmatprep.subr.bf16.mxu0 %v2826_v1 }
 0x136   : > { %1825 = vmatprep.subr.bf16.mxu1 %v2829_v2  ;;  %v361_v2 = vld [vmem:[#allocation2 + $0x8] sm:$0xff] }
 0x138   : > { %1783 = vmatpush2.bf16.msra.mxu0 %v2824_v3 }
 0x139   : > { %1826 = vmatpush2.bf16.msra.mxu1 %v2827_v4  ;;  %1784 = vmatprep.subr.bf16.mxu0 %v2832_v5 }
 0x13a   : > { %1827 = vmatprep.subr.bf16.mxu1 %v2835_v6 }
 0x13c   : > { %1785 = vmatpush2.bf16.msra.mxu0 %v2830_v7 }
 0x13d   : > { %1828 = vmatpush2.bf16.msra.mxu1 %v2833_v8  ;;  %1786 = vmatprep.subr.bf16.mxu0 %v2838_v9 }
 0x13e   : > { %1829 = vmatprep.subr.bf16.mxu1 %v2841_v10 }
 0x140   : > { %1787 = vmatpush2.bf16.msra.mxu0 %v2836_v11 }
 0x141   : > { %1830 = vmatpush2.bf16.msra.mxu1 %v2839_v12  ;;  %1788 = vmatprep.subr.bf16.mxu0 %v2844_v13 }
 0x142   : > { %1831 = vmatprep.subr.bf16.mxu1 %v2847_v14 }
 0x144   : > { %1789 = vmatpush2.bf16.msra.mxu0 %v2842_v15 }
 0x145   : > { %1832 = vmatpush2.bf16.msra.mxu1 %v2845_v16 }
 0x147   : > { %1791 = vmatmul.mubr.bf16.vlgmr.msra.gmra.mxu0 %v2848_v17 }
 0x148   : > { %1834 = vmatmul.mubr.bf16.vlgmr.msra.gmra.mxu1 %v2851_v18 }
 0x187   : > { %v1620_v19 = vpop.f32.mrf.mxu0 }
 0x188   : > { %v1663_v20 = vpop.f32.mrf.mxu1 }
 0x189   : > { %v1622_v21 = vpop.f32.mrf.mxu0  ;;  %v1664_v31 = vadd.f32 %v1663_v20, %v1620_v19 }
 0x18a   : > { %v1665_v22 = vpop.f32.mrf.mxu1 }
 0x18b   : > { %v1624_v23 = vpop.f32.mrf.mxu0  ;;  %v1666_v34 = vadd.f32 %v1665_v22, %v1622_v21 }
 0x18c   : > { %v1667_v24 = vpop.f32.mrf.mxu1 }
 0x18d   : > { %v1626_v25 = vpop.f32.mrf.mxu0  ;;  %v1668_v36 = vadd.f32 %v1667_v24, %v1624_v23 }
 0x18e   : > { %v1669_v26 = vpop.f32.mrf.mxu1 }
 0x18f   : > { %v1670_v40 = vadd.f32 %v1669_v26, %v1626_v25 }
 0x1c7   : > { %v1706_v27 = vpop.f32.mrf.mxu0 }
 0x1c8   : > { %v1749_v28 = vpop.f32.mrf.mxu1  ;;  %v1707_v35 = vadd.f32 %v1706_v27, %v1664_v31 }
 0x1c9   : > { %v1708_v29 = vpop.f32.mrf.mxu0 }
 0x1ca   : > { %v1751_v30 = vpop.f32.mrf.mxu1  ;;  %v1709_v37 = vadd.f32 %v1708_v29, %v1666_v34  ;;  %v1750_v41 = vadd.f32 %v1749_v28, %v1707_v35 }
 0x1cb   : > { %v1710_v32 = vpop.f32.mrf.mxu0 }
 0x1cc   : > { %v1753_v33 = vpop.f32.mrf.mxu1  ;;  %v1711_v42 = vadd.f32 %v1710_v32, %v1668_v36  ;;  %v1752_v45 = vadd.f32 %v1751_v30, %v1709_v37 }
 0x1cd   : > { %v1712_v38 = vpop.f32.mrf.mxu0 }
 0x1ce   : > { %v1755_v39 = vpop.f32.mrf.mxu1  ;;  %v1713_v46 = vadd.f32 %v1712_v38, %v1670_v40  ;;  %v1754_v51 = vadd.f32 %v1753_v33, %v1711_v42 }
 0x1d0   : > { %v1756_v57 = vadd.f32 %v1755_v39, %v1713_v46 }
 0x207   : > { %v1792_v43 = vpop.f32.mrf.mxu0 }
 0x208   : > { %v1835_v44 = vpop.f32.mrf.mxu1  ;;  %v1793_v47 = vadd.f32 %v1792_v43, %v1750_v41 }
 0x209   : > { %v1794_v49 = vpop.f32.mrf.mxu0 }
 0x20a   : > { %v1837_v50 = vpop.f32.mrf.mxu1  ;;  %v1836_v52 = vadd.f32 %v1835_v44, %v1793_v47  ;;  %v1795_v53 = vadd.f32 %v1794_v49, %v1752_v45 }
 0x20b   : > { %v1796_v55 = vpop.f32.mrf.mxu0 }
 0x20c   : > { %v1839_v56 = vpop.f32.mrf.mxu1  ;;  %v1844_v58 = vadd.f32 %v1836_v52, %v358_v48  ;;  %v1838_v59 = vadd.f32 %v1837_v50, %v1795_v53  ;;  %v1797_v60 = vadd.f32 %v1796_v55, %v1754_v51 }
 0x20d   : > { %v1798_v62 = vpop.f32.mrf.mxu0 }
 0x20e   : > { %1848 = vst [vmem:[#allocation2 + $0x10] sm:$0xff] %v1844_v58  ;;  %v1845_v63 = vadd.f32 %v1838_v59, %v359_v54  ;;  %v1840_v0 = vadd.f32 %v1839_v56, %v1797_v60  ;;  %v1799_v1 = vadd.f32 %v1798_v62, %v1756_v57  ;;  %v1841_v3 = vpop.f32.mrf.mxu1 }
 0x210   : > { %1849 = vst [vmem:[#allocation2] sm:$0xff] %v1845_v63  ;;  %v1846_v4 = vadd.f32 %v1840_v0, %v360_v61  ;;  %v1842_v5 = vadd.f32 %v1841_v3, %v1799_v1  ;;  %1855 = sbr.rel (%p2389_p7) target bundleno = 770 (0x302), region = 68 }
 0x212   : > { %1850 = vst [vmem:[#allocation2 + $0x18] sm:$0xff] %v1846_v4  ;;  %v1847_v6 = vadd.f32 %v1842_v5, %v361_v2 }
 0x214   : > { %1851 = vst [vmem:[#allocation2 + $0x8] sm:$0xff] %v1847_v6 }
 0x215   : > { %v2854_v7 = vld [vmem:[#allocation9 + $0x78] sm:$0xff]   ;;  %v2856_v9 = vld [vmem:[#allocation9 + $0x70] sm:$0xff]   ;;  %v2858_v11 = vld [vmem:[#allocation9 + $0x68] sm:$0xff]  }
 0x216   : > { %v2855_v8 = vld [vmem:[#allocation9 + $0x38] sm:$0xff]   ;;  %2415 = vmatprep.subr.bf16.mxu0 %v2854_v7  ;;  %v2857_v10 = vld [vmem:[#allocation9 + $0x30] sm:$0xff]   ;;  %v2859_v12 = vld [vmem:[#allocation9 + $0x28] sm:$0xff]  }
 0x217   : > { %2416 = vmatpush3.bf16.msra.mxu0 %v2855_v8  ;;  %v2860_v13 = vld [vmem:[#allocation9 + $0x60] sm:$0xff]   ;;  %v2862_v15 = vld [vmem:[#allocation9 + $0x58] sm:$0xff]   ;;  %v2864_v17 = vld [vmem:[#allocation9 + $0x50] sm:$0xff]  }
 0x218   : > { %2417 = vmatprep.subr.bf16.mxu0 %v2856_v9  ;;  %v2861_v14 = vld [vmem:[#allocation9 + $0x20] sm:$0xff]   ;;  %v2863_v16 = vld [vmem:[#allocation9 + $0x18] sm:$0xff]   ;;  %v2865_v22 = vld [vmem:[#allocation9 + $0x10] sm:$0xff]  }
 0x219   : > { %v1857_v18 = vld [vmem:[#allocation2] sm:$0xff]  ;;  %v2866_v24 = vld [vmem:[#allocation9 + $0x48] sm:$0xff]   ;;  %v1858_v27 = vld [vmem:[#allocation2 + $0x18] sm:$0xff] }
 0x21a   : > { %v1861_v20 = vmax.f32 %v1857_v18, 0.0  ;;  %v2867_v25 = vld [vmem:[#allocation9 + $0x8] sm:$0xff]   ;;  %v2868_v28 = vld [vmem:[#allocation9 + $0x40] sm:$0xff]   ;;  %v1862_v30 = vmax.f32 %v1858_v27, 0.0 }
 0x21b   : > { %2418 = vmatpush3.bf16.msra.mxu0 %v2857_v10  ;;  %v1859_v19 = vld [vmem:[#allocation2 + $0x8] sm:$0xff]  ;;  %v1856_v26 = vld [vmem:[#allocation2 + $0x10] sm:$0xff]  ;;  %v2390_v34 = vld [vmem:[#allocation11] ss:$0 sm:$0xff] }
 0x21c   : > { %2419 = vmatprep.subr.bf16.mxu0 %v2858_v11  ;;  %v1863_v21 = vmax.f32 %v1859_v19, 0.0  ;;  %v1860_v29 = vmax.f32 %v1856_v26, 0.0  ;;  %v2869_v31 = vld [vmem:[#allocation9] sm:$0xff]  }
 0x21e   : > { %v1865_v23 = vpack.c.bf16 %v1863_v21, %v1861_v20  ;;  %v1864_v32 = vpack.c.bf16 %v1862_v30, %v1860_v29 }
 0x21f   : > { %2420 = vmatpush3.bf16.msra.mxu0 %v2859_v12 }
 0x220   : > { %2421 = vmatprep.subr.bf16.mxu0 %v2860_v13  ;;  %2033 = vmatprep.mubr.bf16.mxu0 %v1865_v23 }
 0x223   : > { %2422 = vmatpush3.bf16.msra.mxu0 %v2861_v14 }
 0x224   : > { %2423 = vmatprep.subr.bf16.mxu0 %v2862_v15 }
 0x227   : > { %2424 = vmatpush3.bf16.msra.mxu0 %v2863_v16 }
 0x228   : > { %2425 = vmatprep.subr.bf16.mxu0 %v2864_v17 }
 0x22b   : > { %2426 = vmatpush3.bf16.msra.mxu0 %v2865_v22 }
 0x22c   : > { %2427 = vmatprep.subr.bf16.mxu0 %v2866_v24 }
 0x22f   : > { %2428 = vmatpush3.bf16.msra.mxu0 %v2867_v25 }
 0x230   : > { %2429 = vmatprep.subr.bf16.mxu0 %v2868_v28 }
 0x233   : > { %2430 = vmatpush3.bf16.msra.mxu0 %v2869_v31 }
 0x236   : > { %2034 = vmatmul.mubr.bf16.vlgmr.msra.gmra.mxu0 %v1864_v32 }
 0x2f6   : > { %v2431_v33 = vpop.f32.mrf.mxu0 }
 0x2f8   : > { %v2432_v35 = vpop.f32.mrf.mxu0 }
 0x2f9   : > { %v2433_v36 = vadd.f32 %v2432_v35, %v2431_v33 }
 0x2fa   : > { %v2434_v37 = vpop.f32.mrf.mxu0 }
 0x2fb   : > { %v2036_v38 = vadd.f32 %v2433_v36, %v2390_v34 }
 0x2fc   : > { %v2435_v39 = vpop.f32.mrf.mxu0 }
 0x2fd   : > { %2042 = vst [vmem:[#allocation12] sm:$0xff] %v2036_v38  ;;  %v2436_v40 = vadd.f32 %v2435_v39, %v2434_v37 }
 0x2ff   : > { %v2039_v41 = vadd.f32 %v2436_v40, %v2390_v34 }
 0x301   : > { %2043 = vst [vmem:[#allocation12 + $0x8] sm:$0xff] %v2039_v41 }
 0x302 PF: > { %p2485_p9 = scmp.eq.s32.totalorder %s3170_s24, 1  ;;  %s3108_s21 = smov [#allocation12]  }
 0x303   : > { %s2053_s26 = sshll.u32 %s3108_s21, 4  ;;  %s2054_s26 = int_to_ptr.vmem [resolvable:$true] %s2053_s26 }
 0x304   : > { %s3004_s27 = scalar_lea.vmem %s2054_s26, 256  ;;  %p3011_p0 = scmp.lt.s32.totalorder %s2054_s26, %s2054_s26 }
 0x305   : > { %p3005_p4 = scmp.ne.s32.totalorder %s2054_s26, %s3004_s27  ;;  %p3012_p1 = scmp.lt.s32.totalorder %s3004_s27, %s3004_s27 }
 0x307   : > { %p3006_p13 = pnand %p3005_p4, %p2485_p9  ;;  %p3013_p5 = por %p3012_p1, %p3011_p0 }
 0x309   : > { %p3007_p10 = pneg %p3006_p13 }
 0x30b   : > { %p3014_p11 = pnand %p3013_p5, %p3007_p10 }
 0x30d   : > { %3017 = shalt.err (!%p3014_p11)
}
 0x30e   : > { %s3109_s25 = smov 128   ;;  %s3110_s11 = smov 8  }
 0x30f   : > { %2458 = dma.vmem_to_hbm [thread:$0]  (%p2485_p9), %s2054_s26, 256, %s3531_s5, [#allocation5], %s3109_s25, %s3109_s25, %s3110_s11  }
 0x310   : > { %3069 = dma.done.wait (%p2485_p9), [#allocation5], 256  }
 0x311   : > { %3071 = vsyncadd (%p2485_p9), [#allocation5], 4294967040 }
 0x312 PF: > { %s23_s23 = sadd.s32 1, %s3094_s23   ;;  %s3555_s16 = smov %s3245_s18 }
 0x313   : > { %p20_p12 = scmp.ge.s32.totalorder %s23_s23, 4   ;;  %s3556_s9 = sld [smem:[#allocation18_spill]] }
 0x314   : > { %s3557_s18 = smov %s3078_s19  ;;  %s3558_s19 = smov %s3082_s20 }
 0x315   : > { %s3559_s20 = smov %s3555_s16  ;;  %s3560_s21 = smov %s3090_s22 }
 0x316   :  { %22 = sbr.rel (!%p20_p12) target bundleno = 13 (0xd), region = 111 }
 0x319   : > { %s3561_s22 = smov %s3556_s9 }
 0x31b   :  { %2069 = vsyncpa [#allocation4], 1 }
 0x31c   :  { %2071 = vsyncpa [#allocation4 + $0x1], 1 }
 0x31d   :  { %2072 = vsyncpa [#allocation7], 1 }
 0x31e   :  { %2074 = vsyncpa [#allocation7 + $0x1], 1 }
 0x31f   :  { %2075 = vsyncpa [#allocation10], 1 }
 0x320   :  { %2076 = vsyncpa [#allocation5], 1 }
 0x321   :  { %2078 = vsyncpa [#allocation5 + $0x1], 1 }

</bundles_post_ra>
